<compile_context>
chip_gen: v7x
topology: tpu7x:2x2x1
jax: 0.10.0
libtpu: 0.0.40
codegen_flags: <defaults>
</compile_context>

<pallas_src>
import math
import functools

import jax
import jax.numpy as jnp
from jax.experimental import pallas as pl
from jax.experimental.pallas import tpu as pltpu


@functools.lru_cache(maxsize=1)
def _vmem_budget():
    """(per-buffer block budget bytes, scoped-vmem limit bytes), generation-aware."""
    vmem_cap = None
    try:
        vmem_cap = pltpu.get_tpu_info().vmem_capacity_bytes
    except Exception:
        vmem_cap = None  # unknown device / emulator: stay conservative (v7x-safe)
    if vmem_cap is not None and vmem_cap >= 96 * 1024 * 1024:
        # v5e / v6e: 128 MiB physical VMEM -> bigger tiles, fewer grid steps.
        return 4 * 1024 * 1024, 64 * 1024 * 1024
    # v7x: 64 MiB per TensorCore -> keep the double-buffered footprint small.
    return 2 * 1024 * 1024, 40 * 1024 * 1024


def _sublane_multiple(dtype) -> int:
    """Sublane tiling multiple: 8 for 32-bit, 16 for 16-bit, 32 for 8-bit dtypes."""
    itemsize = jnp.dtype(dtype).itemsize
    return max(8, 32 // max(itemsize, 1))


def _pick_tile(dim: int, mult: int, cap: int) -> int:
    """Bounded tile: the full dim if it fits under `cap`, else the largest
    multiple of `mult` <= cap.  Ragged edges are handled by pl.cdiv grids and
    Pallas block masking, so no full-dim fallback can exceed the budget."""
    dim, mult = int(dim), int(mult)
    cap = max(int(cap), mult)
    if dim <= cap:
        return dim
    return (cap // mult) * mult


# ----------------------------- kernel bodies --------------------------------


def _swap_mid_kernel(x_ref, o_ref):
    # (td1, td2, tc) -> (td2, td1, tc); trailing lane dim unchanged (sublane
    # relayout only).
    o_ref[...] = jnp.swapaxes(x_ref[...], 0, 1)


def _last2_kernel(x_ref, o_ref, *, ta):
    # (ta, td1, td2) -> (ta, td2, td1): `ta` lane<->sublane 2-D XLU transposes
    # (ta is a small, fixed unroll count <= 8; amortizes per-step overhead).
    for a in range(ta):
        o_ref[a] = x_ref[a].T


def _swap_with_last_kernel(x_ref, o_ref, *, tb):
    # (td1, tb, td2) -> (td2, tb, td1): tb independent 2-D XLU tile transposes
    # with lane-dense (width td1, a 128-multiple or the full dim) output stores.
    # tb <= one sublane tile group, so the unroll is small and fixed.
    for b in range(tb):
        o_ref[:, b, :] = x_ref[:, b, :].T


# ------------------------------- wrapper -------------------------------------


def pallas_transpose(x, dim1: int, dim2: int):
    """Swap two dimensions of x using a Pallas TPU kernel."""
    ndim = x.ndim
    d1 = dim1 % ndim
    d2 = dim2 % ndim
    if d1 == d2:
        return x
    if d1 > d2:
        d1, d2 = d2, d1

    shape = x.shape
    A = math.prod(shape[:d1])
    D1 = shape[d1]
    B = math.prod(shape[d1 + 1:d2])
    D2 = shape[d2]
    C = math.prod(shape[d2 + 1:])

    out_shape = (shape[:d1] + (shape[d2],) + shape[d1 + 1:d2]
                 + (shape[d1],) + shape[d2 + 1:])

    # Degenerate swaps involve no data movement (pure metadata reshape).
    if x.size == 0 or D1 == 1 or D2 == 1:
        return x.reshape(out_shape)

    itemsize = jnp.dtype(x.dtype).itemsize
    sub = _sublane_multiple(x.dtype)
    block_bytes, vmem_limit = _vmem_budget()
    budget = max(block_bytes // itemsize, sub * 128)   # elems per buffer
    cost = pl.CostEstimate(flops=0, transcendentals=0,
                           bytes_accessed=2 * x.size * itemsize)

    def cparams(n_axes):
        return pltpu.CompilerParams(
            dimension_semantics=("parallel",) * n_axes,
            vmem_limit_bytes=vmem_limit)

    # ---- Case 1: adjacent swap of the last two dims (B == 1 and C == 1) ----
    if B == 1 and C == 1:
        x3 = x.reshape(A, D1, D2)
        # td1 is the output lane dim and the input sublane dim (and vice versa
        # for td2); multiples of 128 (or the full dim) keep both sides legal
        # and lane-dense.
        side = max(128, (int(math.isqrt(budget)) // 128) * 128)
        td2 = _pick_tile(D2, 128, side)
        td1 = _pick_tile(D1, 128, max(128, budget // max(td2, 1)))
        ta = _pick_tile(A, 1, min(8, max(1, budget // max(td1 * td2, 1))))
        grid = (pl.cdiv(A, ta), pl.cdiv(D2, td2), pl.cdiv(D1, td1))
        out3 = pl.pallas_call(
            functools.partial(_last2_kernel, ta=ta),
            out_shape=jax.ShapeDtypeStruct((A, D2, D1), x.dtype),
            grid=grid,
            in_specs=[pl.BlockSpec((ta, td1, td2), lambda a, j, i: (a, i, j))],
            out_specs=pl.BlockSpec((ta, td2, td1), lambda a, j, i: (a, j, i)),
            compiler_params=cparams(3),
            cost_estimate=cost,
        )(x3)
        return out3.reshape(out_shape)

    # ---- Case 2: swap a leading dim with the LAST dim (C == 1, B > 1) ------
    if C == 1:
        x4 = x.reshape(A, D1, B, D2)
        # tb: small sublane tile of B (bounds the in-kernel unroll); td1/td2:
        # 128-multiples (or full dims) so input loads and the transposed output
        # stores are both lane-dense.
        tb = _pick_tile(B, sub, min(32, 4 * sub))
        rem = max(budget // max(tb, 1), 128 * 128)
        side = max(128, (int(math.isqrt(rem)) // 128) * 128)
        td2 = _pick_tile(D2, 128, side)
        td1 = _pick_tile(D1, 128, max(128, rem // max(td2, 1)))
        grid = (A, pl.cdiv(D2, td2), pl.cdiv(B, tb), pl.cdiv(D1, td1))
        out4 = pl.pallas_call(
            functools.partial(_swap_with_last_kernel, tb=tb),
            out_shape=jax.ShapeDtypeStruct((A, D2, B, D1), x.dtype),
            grid=grid,
            in_specs=[pl.BlockSpec((pl.Squeezed(), td1, tb, td2),
                                   lambda a, j, b, i: (a, i, b, j))],
            out_specs=pl.BlockSpec((pl.Squeezed(), td2, tb, td1),
                                   lambda a, j, b, i: (a, j, b, i)),
            compiler_params=cparams(4),
            cost_estimate=cost,
        )(x4)
        return out4.reshape(out_shape)

    # ---- Case 3: general swap with trailing C > 1 (lane dim unchanged) -----
    x5 = x.reshape(A, D1, B, D2, C)
    # TODO(synk): for 1 < C < 128 the output stores are C-lane masked; folding C
    # into a lane-dense (td1*C) output slab needs an in-kernel lane reshape.
    tc = _pick_tile(C, 128, max(128, min(1024, budget // (sub * sub))))
    rem = max(budget // max(tc, 1), sub * sub)
    side = max(sub, (int(math.isqrt(rem)) // sub) * sub)
    td2 = _pick_tile(D2, sub, side)
    td1 = _pick_tile(D1, sub, max(sub, rem // max(td2, 1)))
    grid = (A, pl.cdiv(D2, td2), B, pl.cdiv(D1, td1), pl.cdiv(C, tc))
    out5 = pl.pallas_call(
        _swap_mid_kernel,
        out_shape=jax.ShapeDtypeStruct((A, D2, B, D1, C), x.dtype),
        grid=grid,
        in_specs=[pl.BlockSpec(
            (pl.Squeezed(), td1, pl.Squeezed(), td2, tc),
            lambda a, j, b, i, c: (a, i, b, j, c))],
        out_specs=pl.BlockSpec(
            (pl.Squeezed(), td2, pl.Squeezed(), td1, tc),
            lambda a, j, b, i, c: (a, j, b, i, c)),
        compiler_params=cparams(5),
        cost_estimate=cost,
    )(x5)
    return out5.reshape(out_shape)


class Transpose:
    """Pallas-backed equivalent of the PyTorch Transpose nn.Module."""

    def __init__(self, dim1: int, dim2: int):
        self.dim1 = dim1
        self.dim2 = dim2

    def __call__(self, x):
        return pallas_transpose(x, self.dim1, self.dim2)


if __name__ == "__main__":
    key = jax.random.PRNGKey(0)

    # NCHW-style input, matching a typical use inside nn.Sequential.
    x = jax.random.normal(key, (2, 4, 16, 16), dtype=jnp.float32)
    y = jax.block_until_ready(Transpose(1, 2)(x))
    ref = jnp.swapaxes(x, 1, 2)
    assert y.shape == ref.shape and y.dtype == ref.dtype
    assert bool(jnp.array_equal(y, ref)), "mismatch (general path)"

    # Non-8/128-aligned dims on the general path (full-dim blocks + masking).
    xo = jax.random.normal(jax.random.PRNGKey(3), (2, 3, 5, 7), dtype=jnp.float32)
    yo = jax.block_until_ready(Transpose(1, 2)(xo))
    assert bool(jnp.array_equal(yo, jnp.swapaxes(xo, 1, 2))), "mismatch (odd general)"

    # Non-adjacent swap involving the last dim (C == 1, B > 1 lane-dense path).
    x3 = jax.random.normal(jax.random.PRNGKey(1), (2, 8, 32), dtype=jnp.float32)
    y3 = jax.block_until_ready(Transpose(-1, 0)(x3))
    assert bool(jnp.array_equal(y3, jnp.swapaxes(x3, -1, 0))), "mismatch (C==1, B>1)"

    # Adjacent swap of the last two dims (batched 2-D XLU transpose path).
    y3b = jax.block_until_ready(Transpose(1, 2)(x3))
    assert bool(jnp.array_equal(y3b, jnp.swapaxes(x3, 1, 2))), "mismatch (last-2 path)"

    # bf16 sequence-model style swap (B, L, D) -> (B, D, L): dtype-aware tiles.
    xb = jax.random.normal(jax.random.PRNGKey(2), (2, 16, 128), dtype=jnp.bfloat16)
    yb = jax.block_until_ready(Transpose(-1, -2)(xb))
    assert bool(jnp.array_equal(yb, jnp.swapaxes(xb, -1, -2))), "mismatch (bf16)"

    print("KERNEL_OK")
</pallas_src>

<mosaic_0001>
module attributes {stable_mosaic.version = 11 : i64} {
  func.func @_swap_mid_kernel(%arg0: i32, %arg1: i32, %arg2: i32, %arg3: i32, %arg4: i32, %arg5: memref<1x4x1x16x16xf32, #tpu.memory_space<vmem>>, %arg6: memref<1x16x1x4x16xf32, #tpu.memory_space<vmem>>) attributes {dimension_semantics = [#tpu.dimension_semantics<parallel>, #tpu.dimension_semantics<parallel>, #tpu.dimension_semantics<parallel>, #tpu.dimension_semantics<parallel>, #tpu.dimension_semantics<parallel>], iteration_bounds = array<i64: 2, 1, 1, 1, 1>, scalar_prefetch = 0 : i64, scratch_operands = 0 : i64, tpu.core_type = #tpu.core_type<tc>, window_params = [{transform_indices = @transform_0, window_bounds = array<i64: 1, 4, 1, 16, 16>}, {transform_indices = @transform_1, window_bounds = array<i64: 1, 16, 1, 4, 16>}]} {
    %c0 = arith.constant 0 : index
    %c0_0 = arith.constant 0 : index
    %c0_1 = arith.constant 0 : index
    %c0_2 = arith.constant 0 : index
    %c0_3 = arith.constant 0 : index
    %0 = vector.load %arg5[%c0, %c0_0, %c0_1, %c0_2, %c0_3] : memref<1x4x1x16x16xf32, #tpu.memory_space<vmem>>, vector<1x4x1x16x16xf32>
    %1 = vector.shape_cast %0 : vector<1x4x1x16x16xf32> to vector<4x16x16xf32>
    %2 = tpu.transpose %1, [1, 0, 2] : vector<4x16x16xf32> -> vector<16x4x16xf32>
    %c0_4 = arith.constant 0 : index
    %c0_5 = arith.constant 0 : index
    %c0_6 = arith.constant 0 : index
    %c0_7 = arith.constant 0 : index
    %c0_8 = arith.constant 0 : index
    %3 = vector.load %arg6[%c0_4, %c0_5, %c0_6, %c0_7, %c0_8] : memref<1x16x1x4x16xf32, #tpu.memory_space<vmem>>, vector<1x16x1x4x16xf32>
    %4 = vector.shape_cast %3 : vector<1x16x1x4x16xf32> to vector<16x4x16xf32>
    %5 = vector.shape_cast %2 : vector<16x4x16xf32> to vector<1x16x1x4x16xf32>
    tpu.vector_store %arg6[%c0_4, %c0_5, %c0_6, %c0_7, %c0_8], %5 {strides = array<i32>} : memref<1x16x1x4x16xf32, #tpu.memory_space<vmem>>, vector<1x16x1x4x16xf32>,
    return
  }
  func.func @transform_0(%arg0: i32, %arg1: i32, %arg2: i32, %arg3: i32, %arg4: i32) -> (i32, i32, i32, i32, i32) {
    %c0_i32 = arith.constant 0 : i32
    return %arg0, %arg3, %arg2, %arg1, %arg4 : i32, i32, i32, i32, i32
  }
  func.func @transform_1(%arg0: i32, %arg1: i32, %arg2: i32, %arg3: i32, %arg4: i32) -> (i32, i32, i32, i32, i32) {
    %c0_i32 = arith.constant 0 : i32
    return %arg0, %arg1, %arg2, %arg3, %arg4 : i32, i32, i32, i32, i32
  }
}

</mosaic_0001>

<bundles_post_ra>
// kernel: tpu_custom_call.1
= control target key start
LH: loop header
LB: loop body
LE: loop exit
PB: predicated region body
PF: predicated region fallthrough
CT: control target
= control target key end

     0   :  { %6 = vsyncpa [#allocation3], 0  ;;  %s893_s0 = inlined_call_operand.hbm [shape: f32[2,4,1,16,16], index: 0, kind: input, shape index: {}]   ;;  %s894_s1 = inlined_call_operand.hbm [shape: f32[2,16,1,4,16], index: 1, kind: output, shape index: {}]  }
   0x1   :  { %8 = vsyncpa [#allocation3 + $0x1], 0 }
   0x2   :  { %9 = vsyncpa [#allocation4], 0 }
   0x3   :  { %11 = vsyncpa [#allocation4 + $0x1], 0  ;;  %s698_s6 = smov 0   ;;  %s700_s7 = smov 0  }
   0x4   :  { %s702_s8 = smov 0   ;;  %s704_s9 = smov 0  }
   0x5   :  { %s706_s10 = smov 0   ;;  %s708_s11 = smov 0  }
   0x6 LB: > { %s479_s12 = sadd.s32 4294967295, %s677_s11   ;;  %s480_s13 = sadd.s32 4294967294, %s677_s11   ;;  %s677_s11 = sphi %s708_s11, %s17_s11   ;;  %s673_s10 = sphi %s706_s10, %s909_s10   ;;  %s669_s9 = sphi %s704_s9, %s908_s9   ;;  %s665_s8 = sphi %s702_s8, %s907_s8   ;;  %s661_s7 = sphi %s700_s7, %s906_s7   ;;  %s657_s6 = sphi %s698_s6, %s905_s6  }
   0x7   : > { %s50_s14 = sadd.s32 1, %s673_s10  ;;  %s65_s15 = sadd.s32 1, %s665_s8 }
   0x8   : > { %p52_p0 = scmp.ge.s32.totalorder %s50_s14, 2  ;;  %p72_p1 = scmp.ne.s32.totalorder %s665_s8, %s661_s7 }
   0x9   : > { %p73_p2 = scmp.eq.s32.totalorder %s677_s11, 0  ;;  %p78_p3 = scmp.ne.s32.totalorder %s661_s7, %s657_s6 }
   0xa   : > { %s911_s14 = smov (%p52_p0, %s50_s14), 0  ;;  %p79_p5 = scmp.eq.s32.totalorder %s479_s12, 0 }
   0xb   : > { %p739_p4 = por %p73_p2, %p72_p1  ;;  %s54_s17 = ssub.s32 %s673_s10, %s911_s14 }
   0xc   : > { %p110_p6 = scmp.eq.s32.totalorder %s479_s12, 1  ;;  %p63_p7 = scmp.eq.s32.totalorder %s54_s17, 0 }
   0xd   : > { %p745_p8 = por %p79_p5, %p78_p3  ;;  %p116_p10 = scmp.eq.s32.totalorder %s480_s13, 1 }
   0xe   : > { %p749_p9 = por %p110_p6, %p72_p1  ;;  %p508_p13 = scmp.lt.s32.totalorder %s677_s11, 2 }
   0xf   : > { %s754_s20 = scalar_select %p63_p7, %s665_s8, %s65_s15  }
  0x10   : > { %s898_s19 = scalar_select %p749_p9, 1, 0 }
  0x11   : > { %p756_p11 = por %p116_p10, %p78_p3  ;;  %s136_s22 = sand.u32 1, %s665_s8  }
  0x12   : > { %s483_s23 = sshll.u32 %s136_s22, 6  ;;  %s494_s24 = sshll.u32 %s673_s10, 10 }
  0x13   : > { %s899_s21 = scalar_select %p756_p11, 1, 0 }
  0x14   : > { %s767_s27 = scalar_lea.hbm %s893_s0, %s494_s24  ;;  %s140_s28 = scalar_lea.vmem [#allocation2], %s483_s23 }
  0x15   : > { %s155_s29 = sshll.u32 %s140_s28, 4  ;;  %p773_p0 = pnand %p508_p13, %p739_p4  ;;  %s769_s29 = int_to_ptr.vmem [resolvable:$true] %s155_s29 }
  0x16   : > { %s778_s2 = scalar_lea.sflag [#allocation3], %s136_s22  ;;  %s565_s3 = scalar_lea.hbm %s767_s27, 1024 }
  0x17   : > { %p566_p2 = scmp.ne.s32.totalorder %s767_s27, %s565_s3  ;;  %p567_p3 = pneg %p773_p0 }
  0x18   : > { %s570_s12 = scalar_lea.hbm %s893_s0, 2048  ;;  %p571_p4 = scmp.lt.u32.totalorder %s767_s27, %s893_s0 }
  0x19   : > { %p568_p5 = pnand %p567_p3, %p566_p2  ;;  %p572_p7 = scmp.lt.u32.totalorder %s570_s12, %s565_s3 }
  0x1a   : > { %p574_p13 = scmp.lt.u32.totalorder %s565_s3, %s767_s27 }
  0x1b   : > { %p569_p6 = pneg %p568_p5  ;;  %p573_p10 = por %p572_p7, %p571_p4 }
  0x1d   : > { %p575_p12 = por %p574_p13, %p573_p10 }
  0x1f   : > { %p576_p1 = pnand %p575_p12, %p569_p6 }
  0x21   : > { %579 = shalt.err (!%p576_p1)
}
  0x22   : > { %s580_s16 = scalar_lea.vmem %s769_s29, 1024  ;;  %s679_s17 = smov [#allocation2]  }
  0x23   : > { %p581_p2 = scmp.ne.s32.totalorder %s769_s29, %s580_s16  ;;  %s585_s22 = sshll.u32 %s679_s17, 4  ;;  %s586_s22 = int_to_ptr.vmem [resolvable:$false] %s585_s22 }
  0x24   : > { %s587_s23 = scalar_lea.vmem %s586_s22, 2048  ;;  %p588_p9 = scmp.lt.s32.totalorder %s769_s29, %s586_s22 }
  0x25   : > { %p583_p5 = pnand %p581_p2, %p567_p3  ;;  %p589_p4 = scmp.lt.s32.totalorder %s587_s23, %s580_s16 }
  0x27   : > { %p584_p11 = pneg %p583_p5  ;;  %p590_p7 = por %p589_p4, %p588_p9 }
  0x29   : > { %p591_p10 = pnand %p590_p7, %p584_p11 }
  0x2b   : > { %594 = shalt.err (!%p591_p10)
}
  0x2c   : > { %s680_s24 = smov 128   ;;  %s681_s25 = smov 8  }
  0x2d   : > { %503 = dma.hbm_to_vmem [thread:$0]  (!%p773_p0), %s767_s27, 1024, %s769_s29, %s778_s2, %s680_s24, %s680_s24, %s681_s25  }
  0x2e   : > { %p163_p12 = scmp.lt.s32.totalorder %s677_s11, 3  ;;  %p901_p1 = scmp.ge.s32.totalorder %s677_s11, 1 }
  0x30   : > { %p164_p3 = pnand %p901_p1, %p163_p12 }
  0x31   : > { %s810_s26 = sand.u32 (!%p164_p3), 1, %s661_s7  }
  0x32   : > { %167 = sbr.rel (%p164_p3) target bundleno = 93 (0x5d), region = 24  ;;  %s487_s28 = sshll.u32 (!%p164_p3), %s810_s26, 6 }
  0x33   : > { %s170_s3 = scalar_lea.sflag (!%p164_p3), [#allocation3], %s810_s26  ;;  %s173_s4 = scalar_lea.vmem (!%p164_p3), [#allocation2], %s487_s28 }
  0x39   : > { %648 = dma.done.wait (%p745_p8), %s170_s3, 1024  }
  0x3a   : > { %650 = vsyncadd (%p745_p8), %s170_s3, 4294966272  ;;  %v208_v0 = vlaneseq  ;;  %v682_v1 = vmov 1983009808   ;;  %v683_v3 = vmov 1934713408   ;;  %v195_v9 = vld [vmem:[%s173_s4] sm:$0xff] }
  0x3b   : > { %v206_v2 = vunpack.c.l.s4 %v682_v1  ;;  %v238_v4 = vunpack.c.l.s4 %v683_v3  ;;  %v197_v10 = vld [vmem:[%s173_s4 + $0x10] sm:$0xff]  ;;  %v199_v11 = vld [vmem:[%s173_s4 + $0x20] sm:$0xff]  ;;  %v196_v15 = vld [vmem:[%s173_s4 + $0x8] sm:$0xff]  ;;  %vm339_vm0 = vcmask 125952   ;;  %s495_s18 = sshll.u32 %s669_s9, 10  ;;  %s191_s27 = scalar_lea.vmem [#allocation5], %s487_s28 }
  0x3c   : > { %v209_v5 = vshrl.u32 %v208_v0, 7  ;;  %v201_v12 = vld [vmem:[%s173_s4 + $0x30] sm:$0xff]  ;;  %v203_v13 = vcombine.low %v195_v9, %v199_v11  ;;  %v204_v14 = vcombine.high %v195_v9, %v199_v11  ;;  %v198_v16 = vld [vmem:[%s173_s4 + $0x18] sm:$0xff]  ;;  %v200_v20 = vld [vmem:[%s173_s4 + $0x28] sm:$0xff]  ;;  %s375_s29 = sshll.u32 %s191_s27, 4  ;;  %v684_v48 = vmov 0.0   ;;  %s836_s2 = scalar_lea.hbm %s894_s1, %s495_s18  ;;  %s838_s29 = int_to_ptr.vmem [resolvable:$true] %s375_s29 }
  0x3d   : > { %v207_v6 = vunpack.c.0.s8 %v206_v2  ;;  %v239_v7 = vunpack.c.0.s8 %v238_v4  ;;  %v219_v17 = vcombine.low %v197_v10, %v201_v12  ;;  %v220_v19 = vcombine.high %v197_v10, %v201_v12  ;;  %v202_v21 = vld [vmem:[%s173_s4 + $0x38] sm:$0xff]  ;;  %s357_s5 = scalar_lea.sflag [#allocation4], %s810_s26  ;;  %s595_s12 = scalar_lea.vmem %s838_s29, 1024 }
  0x3e   : > { %v271_v24 = vcombine.low %v196_v15, %v200_v20  ;;  %v287_v25 = vcombine.low %v198_v16, %v202_v21  ;;  %v272_v28 = vcombine.high %v196_v15, %v200_v20  ;;  %v288_v29 = vcombine.high %v198_v16, %v202_v21  ;;  %p596_p8 = scmp.ne.s32.totalorder %s838_s29, %s595_s12  ;;  %p902_p9 = scmp.ne.s32.totalorder %s898_s19, 0 }
  0x3f   : > { %v210_v8 = vsub.s32 %v207_v6, %v209_v5  ;;  %v242_v18 = vsub.s32 %v239_v7, %v209_v5  ;;  %s685_s13 = smov [#allocation5]  }
  0x40   : > { %p597_p11 = pnand %p596_p8, %p902_p9  ;;  %s599_s15 = sshll.u32 %s685_s13, 4  ;;  %s600_s15 = int_to_ptr.vmem [resolvable:$false] %s599_s15 }
  0x41   : > { %v211_v22 = vrot.slane %v203_v13, %v210_v8  ;;  %v218_v23 = vrot.slane %v204_v14, %v210_v8  ;;  %v227_v26 = vrot.slane %v219_v17, %v210_v8  ;;  %v234_v27 = vrot.slane %v220_v19, %v210_v8  ;;  %s601_s16 = scalar_lea.vmem %s600_s15, 2048  ;;  %p602_p6 = scmp.lt.s32.totalorder %s838_s29, %s600_s15 }
  0x42   : > { %v279_v30 = vrot.slane %v271_v24, %v210_v8  ;;  %v295_v31 = vrot.slane %v287_v25, %v210_v8  ;;  %v286_v38 = vrot.slane %v272_v28, %v210_v8  ;;  %v302_v39 = vrot.slane %v288_v29, %v210_v8  ;;  %p598_p0 = pneg %p597_p11  ;;  %p603_p13 = scmp.lt.s32.totalorder %s601_s16, %s595_s12 }
  0x43   : > { %v235_v32 = vcombine.low %v211_v22, %v227_v26  ;;  %v236_v33 = vcombine.high %v211_v22, %v227_v26  ;;  %v251_v34 = vcombine.low %v218_v23, %v234_v27  ;;  %v252_v35 = vcombine.high %v218_v23, %v234_v27 }
  0x44   : > { %v303_v36 = vcombine.low %v279_v30, %v295_v31  ;;  %v304_v37 = vcombine.high %v279_v30, %v295_v31  ;;  %v319_v46 = vcombine.low %v286_v38, %v302_v39  ;;  %v320_v47 = vcombine.high %v286_v38, %v302_v39  ;;  %p604_p2 = por %p603_p13, %p602_p6 }
  0x45   : > { %v243_v40 = vrot.slane %v235_v32, %v242_v18  ;;  %v250_v41 = vrot.slane %v236_v33, %v242_v18  ;;  %v259_v42 = vrot.slane %v251_v34, %v242_v18  ;;  %v266_v43 = vrot.slane %v252_v35, %v242_v18 }
  0x46   : > { %v311_v44 = vrot.slane %v303_v36, %v242_v18  ;;  %v318_v45 = vrot.slane %v304_v37, %v242_v18  ;;  %v327_v55 = vrot.slane %v319_v46, %v242_v18  ;;  %v334_v56 = vrot.slane %v320_v47, %v242_v18  ;;  %p605_p5 = pnand %p604_p2, %p598_p0 }
  0x47   : > { %340 = vst.msk [vmem:[%s191_s27] sm:$0xf] %vm339_vm0, %v243_v40  ;;  %v267_v49 = vcombine.high %v243_v40, %v684_v48  ;;  %342 = vst.msk [vmem:[%s191_s27 + $0x8] sm:$0xf] %vm339_vm0, %v250_v41  ;;  %v268_v50 = vcombine.high %v250_v41, %v684_v48  ;;  %v269_v51 = vcombine.high %v259_v42, %v684_v48 }
  0x48   : > { %344 = vst.msk [vmem:[%s191_s27 + $0x10] sm:$0xf] %vm339_vm0, %v259_v42  ;;  %346 = vst.msk [vmem:[%s191_s27 + $0x18] sm:$0xf] %vm339_vm0, %v266_v43  ;;  %v270_v52 = vcombine.high %v266_v43, %v684_v48  ;;  %v335_v53 = vcombine.high %v311_v44, %v684_v48  ;;  %v336_v54 = vcombine.high %v318_v45, %v684_v48 }
  0x49   : > { %348 = vst.msk [vmem:[%s191_s27 + $0x20] sm:$0xf] %vm339_vm0, %v311_v44  ;;  %350 = vst.msk [vmem:[%s191_s27 + $0x28] sm:$0xf] %vm339_vm0, %v318_v45  ;;  %v337_v57 = vcombine.high %v327_v55, %v684_v48  ;;  %v338_v58 = vcombine.high %v334_v56, %v684_v48 }
  0x4a   : > { %341 = vst.msk [vmem:[%s191_s27 + $0x4] sm:$0xf] %vm339_vm0, %v267_v49  ;;  %343 = vst.msk [vmem:[%s191_s27 + $0xc] sm:$0xf] %vm339_vm0, %v268_v50 }
  0x4b   : > { %345 = vst.msk [vmem:[%s191_s27 + $0x14] sm:$0xf] %vm339_vm0, %v269_v51  ;;  %347 = vst.msk [vmem:[%s191_s27 + $0x1c] sm:$0xf] %vm339_vm0, %v270_v52 }
  0x4c   : > { %349 = vst.msk [vmem:[%s191_s27 + $0x24] sm:$0xf] %vm339_vm0, %v335_v53  ;;  %351 = vst.msk [vmem:[%s191_s27 + $0x2c] sm:$0xf] %vm339_vm0, %v336_v54 }
  0x4d   : > { %352 = vst.msk [vmem:[%s191_s27 + $0x30] sm:$0xf] %vm339_vm0, %v327_v55  ;;  %354 = vst.msk [vmem:[%s191_s27 + $0x38] sm:$0xf] %vm339_vm0, %v334_v56 }
  0x4e   : > { %353 = vst.msk [vmem:[%s191_s27 + $0x34] sm:$0xf] %vm339_vm0, %v337_v57  ;;  %355 = vst.msk [vmem:[%s191_s27 + $0x3c] sm:$0xf] %vm339_vm0, %v338_v58 }
  0x4f   : > { %608 = shalt.err (!%p605_p5)
}
  0x50   : > { %s609_s17 = scalar_lea.hbm %s836_s2, 1024  ;;  %s613_s24 = scalar_lea.hbm %s894_s1, 2048 }
  0x51   : > { %p610_p4 = scmp.ne.s32.totalorder %s836_s2, %s609_s17  ;;  %p614_p12 = scmp.lt.u32.totalorder %s836_s2, %s894_s1 }
  0x52   : > { %p615_p1 = scmp.lt.u32.totalorder %s613_s24, %s609_s17  ;;  %p617_p8 = scmp.lt.u32.totalorder %s609_s17, %s836_s2 }
  0x53   : > { %p611_p7 = pnand %p610_p4, %p902_p9 }
  0x54   : > { %p616_p3 = por %p615_p1, %p614_p12 }
  0x55   : > { %p612_p10 = pneg %p611_p7 }
  0x56   : > { %p618_p11 = por %p617_p8, %p616_p3 }
  0x58   : > { %p619_p0 = pnand %p618_p11, %p612_p10 }
  0x5a   : > { %622 = shalt.err (!%p619_p0)
}
  0x5b   : > { %s686_s3 = smov 64   ;;  %s687_s4 = smov 4  }
  0x5c   : > { %498 = dma.vmem_to_hbm [thread:$0]  (%p902_p9), %s838_s29, 1024, %s836_s2, %s357_s5, %s686_s3, %s686_s3, %s687_s4  }
  0x5d PF: > { %s390_s18 = sand.u32 1, %s657_s6   ;;  %p903_p6 = scmp.ne.s32.totalorder %s899_s21, 0 }
  0x5e   : > { %p904_p13 = scmp.ge.s32.totalorder %s677_s11, 2  ;;  %s391_s27 = scalar_lea.sflag [#allocation4], %s390_s18 }
  0x60   : > { %p505_p2 = pnand %p904_p13, %p903_p6 }
  0x62   : > { %652 = dma.done.wait (!%p505_p2), %s391_s27, 1024  }
  0x63   : > { %654 = vsyncadd (!%p505_p2), %s391_s27, 4294966272  ;;  %s17_s11 = sadd.s32 1, %s677_s11   ;;  %s905_s6 = smov %s661_s7 }
  0x64   : > { %p14_p5 = scmp.ge.s32.totalorder %s17_s11, 4   ;;  %s906_s7 = smov %s665_s8 }
  0x65   : > { %s907_s8 = smov %s754_s20  ;;  %s908_s9 = smov %s673_s10 }
  0x66   : > { %s909_s10 = smov %s911_s14  ;;  %16 = sbr.rel (!%p14_p5) target bundleno = 6 (0x6), region = 69 }
  0x6d   :  { %396 = vsyncpa [#allocation3], 1 }
  0x6e   :  { %398 = vsyncpa [#allocation3 + $0x1], 1 }
  0x6f   :  { %399 = vsyncpa [#allocation4], 1 }
  0x70   :  { %401 = vsyncpa [#allocation4 + $0x1], 1 }

</bundles_post_ra>
